<compile_context>
chip_gen: v7x
topology: tpu7x:2x2x1
jax: 0.10.0
libtpu: 0.0.40
codegen_flags: <defaults>
</compile_context>

<pallas_src>
import functools

import jax
import jax.numpy as jnp
from jax import lax
from jax.experimental import pallas as pl
from jax.experimental.pallas import tpu as pltpu


def _ntxent_block_kernel(z1_ref, z2_ref, kcat_ref, out_ref, *, TM, Bp, B_real, tau):
    """One grid step: TM pairs of rows (view-1 row r and view-2 row r).

    z1_ref, z2_ref : (TM, Dp)  bf16, pre-normalized query strips
    kcat_ref       : (2*Bp, Dp) bf16, pre-normalized keys [view-1 ; view-2]
    out_ref        : (TM, 1)   f32, per-pair loss (view-1 row + view-2 row)
    """
    row0 = pl.program_id(0) * TM          # global row base within each half
    inv_tau = jnp.float32(1.0 / tau)

    q1 = z1_ref[...]                      # (TM, Dp) bf16
    q2 = z2_ref[...]
    k = kcat_ref[...]                     # (2*Bp, Dp) bf16

    # ---- similarity strips on the MXU (bf16 operands, f32 accumulation);
    #      contract over D for both operands -> no key transpose / relayout ----
    dn = (((1,), (1,)), ((), ()))
    s1 = lax.dot_general(q1, k, dn, preferred_element_type=jnp.float32) * inv_tau  # (TM, 2Bp)
    s2 = lax.dot_general(q2, k, dn, preferred_element_type=jnp.float32) * inv_tau  # (TM, 2Bp)

    # positive-pair logit: (z1n_r . z2n_r) / tau (same value for both views)
    pair = jnp.sum(q1.astype(jnp.float32) * q2.astype(jnp.float32),
                   axis=1, keepdims=True) * inv_tau                                 # (TM, 1)

    # ---- self-similarity + padded-key masking with strip-local iotas ----
    r = lax.broadcasted_iota(jnp.int32, (TM, 2 * Bp), 0) + row0   # global row in a half
    c = lax.broadcasted_iota(jnp.int32, (TM, 2 * Bp), 1)          # key column in [0, 2Bp)
    c_local = jnp.where(c < Bp, c, c - Bp)                        # column within its half
    pad_key = c_local >= B_real                                   # zero-padded key rows
    neg_inf = jnp.float32(-jnp.inf)
    s1 = jnp.where((c == r) | pad_key, neg_inf, s1)               # view-1 query vs itself
    s2 = jnp.where((c == r + Bp) | pad_key, neg_inf, s2)          # view-2 query vs itself

    # ---- row-wise logsumexp over all 2B keys (XLU max/sum, EUP exp/log) ----
    m1 = jnp.max(s1, axis=1, keepdims=True)                       # (TM, 1)
    m2 = jnp.max(s2, axis=1, keepdims=True)
    lse1 = m1 + jnp.log(jnp.sum(jnp.exp(s1 - m1), axis=1, keepdims=True))
    lse2 = m2 + jnp.log(jnp.sum(jnp.exp(s2 - m2), axis=1, keepdims=True))

    # per-pair loss (view-1 row + view-2 row); padded rows contribute 0
    per_pair = lse1 + lse2 - 2.0 * pair                           # (TM, 1)
    valid = (lax.broadcasted_iota(jnp.int32, (TM, 1), 0) + row0) < B_real
    out_ref[...] = jnp.where(valid, per_pair, 0.0)


def _vmem_capacity_bytes():
    """Physical per-core VMEM; falls back to the v7x (smallest) value."""
    try:
        return int(pltpu.get_tpu_info().vmem_capacity_bytes)
    except Exception:
        return 64 << 20


def _vmem_estimate(tm, Bp, Dp):
    keys = 4 * Bp * Dp            # (2Bp, Dp) bf16 keys, single-buffered
    strips = 8 * tm * Dp          # 2 query specs x 2 pipeline buffers x bf16
    temps = 32 * tm * Bp          # s1/s2 + exp temps, ~4x (TM, 2Bp) f32
    return keys + strips + temps + (2 << 20)   # + compiler scratch margin


def _pick_tile(Bp, Dp, budget):
    """Largest TM (multiple of 8, divisor of Bp) fitting the VMEM budget,
    keeping >= 2 grid steps (preferably an even count) for megacore."""
    best = 8
    best_even = 0
    for tm in range(8, min(Bp, 1024) + 1, 8):
        if Bp % tm:
            continue
        nb = Bp // tm
        if Bp >= 16 and nb < 2:        # keep both TensorCores busy on v7x
            continue
        if _vmem_estimate(tm, Bp, Dp) > budget:
            continue
        best = max(best, tm)
        if nb % 2 == 0:
            best_even = max(best_even, tm)
    return best_even if best_even else best


def ntxent_loss(z1, z2, tau=0.5):
    B, D = z1.shape

    # ---- normalize once in the wrapper (O(B*D)), rsqrt instead of divide ----
    z1 = z1.astype(jnp.float32)
    z2 = z2.astype(jnp.float32)
    z1n = z1 * lax.rsqrt(jnp.maximum(jnp.sum(z1 * z1, axis=1, keepdims=True), 1e-24))
    z2n = z2 * lax.rsqrt(jnp.maximum(jnp.sum(z2 * z2, axis=1, keepdims=True), 1e-24))

    # ---- pad: B -> multiple of 8 (sublane rule), D -> multiple of 128 (lanes) ----
    Bp = ((B + 7) // 8) * 8
    Dp = ((D + 127) // 128) * 128
    pad = ((0, Bp - B), (0, Dp - D))
    z1p = jnp.pad(z1n, pad).astype(jnp.bfloat16)     # bf16 MXU operands
    z2p = jnp.pad(z2n, pad).astype(jnp.bfloat16)
    kcat = jnp.concatenate([z1p, z2p], axis=0)       # (2*Bp, Dp) fused key matrix

    # ---- tile / VMEM budgeting from the actual device capacity ----
    cap = _vmem_capacity_bytes()
    budget = int(cap * 0.45)
    TM = _pick_tile(Bp, Dp, budget)
    n_blocks = Bp // TM
    est = _vmem_estimate(TM, Bp, Dp)
    vmem_limit = int(min(int(cap * 0.9), max(32 << 20, 2 * est)))

    kernel = functools.partial(_ntxent_block_kernel,
                               TM=TM, Bp=Bp, B_real=B, tau=float(tau))
    per_pair = pl.pallas_call(
        kernel,
        out_shape=jax.ShapeDtypeStruct((Bp, 1), jnp.float32),
        grid=(n_blocks,),
        in_specs=[
            pl.BlockSpec((TM, Dp), lambda i: (i, 0)),        # view-1 query strip
            pl.BlockSpec((TM, Dp), lambda i: (i, 0)),        # view-2 query strip
            pl.BlockSpec((2 * Bp, Dp), lambda i: (0, 0),     # resident fused keys
                         pipeline_mode=pl.Buffered(1)),      # constant block: no double-buffer
        ],
        out_specs=pl.BlockSpec((TM, 1), lambda i: (i, 0)),
        compiler_params=pltpu.CompilerParams(
            dimension_semantics=("parallel",),
            vmem_limit_bytes=vmem_limit,
        ),
    )(z1p, z2p, kcat)

    # per_pair row r = (lse over keys for view-1 row r) + (same for view-2 row r)
    # minus 2 * positive logit; padded rows are already zero.
    return jnp.sum(per_pair) / (2 * B)

# TODO(synk): for very large B the full fused key matrix is still resident in
# VMEM; a second (key) grid axis with an online-softmax carry would remove that
# limit.


def ntxent_loss_ref(z1, z2, tau=0.5):
    # Pure-JAX reference mirroring the PyTorch forward.
    B, _ = z1.shape
    z = jnp.concatenate([z1, z2], axis=0)
    z = z / jnp.maximum(jnp.linalg.norm(z, axis=1, keepdims=True), 1e-12)
    sim = (z @ z.T) / tau
    n = 2 * B
    sim = jnp.where(jnp.eye(n, dtype=bool), -jnp.inf, sim)
    labels = jnp.concatenate([jnp.arange(B) + B, jnp.arange(B)])
    lse = jax.nn.logsumexp(sim, axis=1)
    tgt = sim[jnp.arange(n), labels]
    return jnp.mean(lse - tgt)


if __name__ == "__main__":
    key = jax.random.PRNGKey(0)
    k1, k2, k3, k4 = jax.random.split(key, 4)

    # primary small shape consistent with the module
    B, D = 8, 32
    z1 = jax.random.normal(k1, (B, D), dtype=jnp.float32)
    z2 = jax.random.normal(k2, (B, D), dtype=jnp.float32)
    loss = ntxent_loss(z1, z2, tau=0.5)
    jax.block_until_ready(loss)
    ref = ntxent_loss_ref(z1, z2, tau=0.5)
    # bf16 MXU operands -> looser tolerance than the old f32-only check
    assert jnp.allclose(loss, ref, rtol=5e-2, atol=5e-2), (loss, ref)

    # second shape exercising the B (sublane) and D (lane) padding paths
    z1b = jax.random.normal(k3, (6, 40), dtype=jnp.float32)
    z2b = jax.random.normal(k4, (6, 40), dtype=jnp.float32)
    loss_b = ntxent_loss(z1b, z2b, tau=0.5)
    jax.block_until_ready(loss_b)
    ref_b = ntxent_loss_ref(z1b, z2b, tau=0.5)
    assert jnp.allclose(loss_b, ref_b, rtol=5e-2, atol=5e-2), (loss_b, ref_b)

    print("KERNEL_OK")
</pallas_src>

<mosaic_0001>
module attributes {stable_mosaic.version = 11 : i64} {
  func.func @_ntxent_block_kernel(%arg0: i32, %arg1: memref<8x128xbf16, #tpu.memory_space<vmem>>, %arg2: memref<8x128xbf16, #tpu.memory_space<vmem>>, %arg3: memref<16x128xbf16, #tpu.memory_space<vmem>>, %arg4: memref<8x1xf32, #tpu.memory_space<vmem>>) attributes {dimension_semantics = [#tpu.dimension_semantics<parallel>], iteration_bounds = array<i64: 1>, scalar_prefetch = 0 : i64, scratch_operands = 0 : i64, tpu.core_type = #tpu.core_type<tc>, window_params = [{transform_indices = @transform_0, window_bounds = array<i64: 8, 128>}, {transform_indices = @transform_1, window_bounds = array<i64: 8, 128>}, {pipeline_mode = #tpu.pipeline_mode<synchronous>, transform_indices = @transform_2, window_bounds = array<i64: 16, 128>}, {transform_indices = @transform_3, window_bounds = array<i64: 8, 1>}]} {
    %c8_i32 = arith.constant 8 : i32
    %0 = arith.muli %arg0, %c8_i32 : i32
    %c0 = arith.constant 0 : index
    %c0_0 = arith.constant 0 : index
    %1 = vector.load %arg1[%c0, %c0_0] : memref<8x128xbf16, #tpu.memory_space<vmem>>, vector<8x128xbf16>
    %c0_1 = arith.constant 0 : index
    %c0_2 = arith.constant 0 : index
    %2 = vector.load %arg2[%c0_1, %c0_2] : memref<8x128xbf16, #tpu.memory_space<vmem>>, vector<8x128xbf16>
    %c0_3 = arith.constant 0 : index
    %c0_4 = arith.constant 0 : index
    %3 = vector.load %arg3[%c0_3, %c0_4] : memref<16x128xbf16, #tpu.memory_space<vmem>>, vector<16x128xbf16>
    %cst = arith.constant dense<0.000000e+00> : vector<8x16xf32>
    %4 = tpu.matmul %1, %3, %cst {dimension_numbers = #tpu.dot_dimension_numbers<[1], [1], [0], [0], [0, 0, 1, 0], [], []>} : vector<8x128xbf16>, vector<16x128xbf16>, vector<8x16xf32> -> vector<8x16xf32>
    %cst_5 = arith.constant 2.000000e+00 : f32
    %5 = vector.broadcast %cst_5 : f32 to vector<8x16xf32>
    %6 = arith.mulf %4, %5 : vector<8x16xf32>
    %cst_6 = arith.constant dense<0.000000e+00> : vector<8x16xf32>
    %7 = tpu.matmul %2, %3, %cst_6 {dimension_numbers = #tpu.dot_dimension_numbers<[1], [1], [0], [0], [0, 0, 1, 0], [], []>} : vector<8x128xbf16>, vector<16x128xbf16>, vector<8x16xf32> -> vector<8x16xf32>
    %cst_7 = arith.constant 2.000000e+00 : f32
    %8 = vector.broadcast %cst_7 : f32 to vector<8x16xf32>
    %9 = arith.mulf %7, %8 : vector<8x16xf32>
    %10 = arith.extf %1 : vector<8x128xbf16> to vector<8x128xf32>
    %11 = arith.extf %2 : vector<8x128xbf16> to vector<8x128xf32>
    %12 = arith.mulf %10, %11 : vector<8x128xf32>
    %cst_8 = arith.constant dense<0.000000e+00> : vector<8xf32>
    %13 = vector.multi_reduction <add>, %12, %cst_8 [1] : vector<8x128xf32> to vector<8xf32>
    %14 = vector.shape_cast %13 : vector<8xf32> to vector<8x1xf32>
    %cst_9 = arith.constant 2.000000e+00 : f32
    %15 = vector.broadcast %cst_9 : f32 to vector<8x1xf32>
    %16 = arith.mulf %14, %15 : vector<8x1xf32>
    %17 = tpu.iota {dimensions = array<i32: 0>} : vector<8x16xi32>
    %18 = vector.broadcast %0 : i32 to vector<8x16xi32>
    %19 = arith.addi %17, %18 : vector<8x16xi32>
    %20 = tpu.iota {dimensions = array<i32: 1>} : vector<8x16xi32>
    %c8_i32_10 = arith.constant 8 : i32
    %21 = vector.broadcast %c8_i32_10 : i32 to vector<8x16xi32>
    %22 = arith.cmpi slt, %20, %21 : vector<8x16xi32>
    %c8_i32_11 = arith.constant 8 : i32
    %23 = vector.broadcast %c8_i32_11 : i32 to vector<8x16xi32>
    %24 = arith.subi %20, %23 : vector<8x16xi32>
    %25 = arith.select %22, %20, %24 : vector<8x16xi1>, vector<8x16xi32>
    %c8_i32_12 = arith.constant 8 : i32
    %26 = vector.broadcast %c8_i32_12 : i32 to vector<8x16xi32>
    %27 = arith.cmpi sge, %25, %26 : vector<8x16xi32>
    %28 = arith.cmpi eq, %20, %19 : vector<8x16xi32>
    %29 = arith.ori %28, %27 : vector<8x16xi1>
    %cst_13 = arith.constant 0xFF800000 : f32
    %30 = vector.broadcast %cst_13 : f32 to vector<8x16xf32>
    %31 = arith.select %29, %30, %6 : vector<8x16xi1>, vector<8x16xf32>
    %c8_i32_14 = arith.constant 8 : i32
    %32 = vector.broadcast %c8_i32_14 : i32 to vector<8x16xi32>
    %33 = arith.addi %19, %32 : vector<8x16xi32>
    %34 = arith.cmpi eq, %20, %33 : vector<8x16xi32>
    %35 = arith.ori %34, %27 : vector<8x16xi1>
    %cst_15 = arith.constant 0xFF800000 : f32
    %36 = vector.broadcast %cst_15 : f32 to vector<8x16xf32>
    %37 = arith.select %35, %36, %9 : vector<8x16xi1>, vector<8x16xf32>
    %cst_16 = arith.constant dense<0xFF800000> : vector<8xf32>
    %38 = vector.multi_reduction <maximumf>, %31, %cst_16 [1] : vector<8x16xf32> to vector<8xf32>
    %39 = vector.shape_cast %38 : vector<8xf32> to vector<8x1xf32>
    %cst_17 = arith.constant dense<0xFF800000> : vector<8xf32>
    %40 = vector.multi_reduction <maximumf>, %37, %cst_17 [1] : vector<8x16xf32> to vector<8xf32>
    %41 = vector.shape_cast %40 : vector<8xf32> to vector<8x1xf32>
    %42 = vector.broadcast %39 : vector<8x1xf32> to vector<8x16xf32>
    %43 = arith.subf %31, %42 : vector<8x16xf32>
    %44 = math.exp %43 : vector<8x16xf32>
    %cst_18 = arith.constant dense<0.000000e+00> : vector<8xf32>
    %45 = vector.multi_reduction <add>, %44, %cst_18 [1] : vector<8x16xf32> to vector<8xf32>
    %46 = vector.shape_cast %45 : vector<8xf32> to vector<8x1xf32>
    %47 = math.log %46 : vector<8x1xf32>
    %48 = arith.addf %39, %47 : vector<8x1xf32>
    %49 = vector.broadcast %41 : vector<8x1xf32> to vector<8x16xf32>
    %50 = arith.subf %37, %49 : vector<8x16xf32>
    %51 = math.exp %50 : vector<8x16xf32>
    %cst_19 = arith.constant dense<0.000000e+00> : vector<8xf32>
    %52 = vector.multi_reduction <add>, %51, %cst_19 [1] : vector<8x16xf32> to vector<8xf32>
    %53 = vector.shape_cast %52 : vector<8xf32> to vector<8x1xf32>
    %54 = math.log %53 : vector<8x1xf32>
    %55 = arith.addf %41, %54 : vector<8x1xf32>
    %56 = arith.addf %48, %55 : vector<8x1xf32>
    %cst_20 = arith.constant 2.000000e+00 : f32
    %57 = vector.broadcast %cst_20 : f32 to vector<8x1xf32>
    %58 = arith.mulf %57, %16 : vector<8x1xf32>
    %59 = arith.subf %56, %58 : vector<8x1xf32>
    %60 = tpu.iota {dimensions = array<i32: 0>} : vector<8x1xi32>
    %61 = vector.broadcast %0 : i32 to vector<8x1xi32>
    %62 = arith.addi %60, %61 : vector<8x1xi32>
    %c8_i32_21 = arith.constant 8 : i32
    %63 = vector.broadcast %c8_i32_21 : i32 to vector<8x1xi32>
    %64 = arith.cmpi slt, %62, %63 : vector<8x1xi32>
    %cst_22 = arith.constant 0.000000e+00 : f32
    %65 = vector.broadcast %cst_22 : f32 to vector<8x1xf32>
    %66 = arith.select %64, %59, %65 : vector<8x1xi1>, vector<8x1xf32>
    %c0_23 = arith.constant 0 : index
    %c0_24 = arith.constant 0 : index
    %67 = vector.load %arg4[%c0_23, %c0_24] : memref<8x1xf32, #tpu.memory_space<vmem>>, vector<8x1xf32>
    tpu.vector_store %arg4[%c0_23, %c0_24], %66 {strides = array<i32>} : memref<8x1xf32, #tpu.memory_space<vmem>>, vector<8x1xf32>,
    return
  }
  func.func @transform_0(%arg0: i32) -> (i32, i32) {
    %c0_i32 = arith.constant 0 : i32
    %c0_i32_0 = arith.constant 0 : i32
    return %arg0, %c0_i32 : i32, i32
  }
  func.func @transform_1(%arg0: i32) -> (i32, i32) {
    %c0_i32 = arith.constant 0 : i32
    %c0_i32_0 = arith.constant 0 : i32
    return %arg0, %c0_i32 : i32, i32
  }
  func.func @transform_2(%arg0: i32) -> (i32, i32) {
    %c0_i32 = arith.constant 0 : i32
    %c0_i32_0 = arith.constant 0 : i32
    %c0_i32_1 = arith.constant 0 : i32
    return %c0_i32, %c0_i32_0 : i32, i32
  }
  func.func @transform_3(%arg0: i32) -> (i32, i32) {
    %c0_i32 = arith.constant 0 : i32
    %c0_i32_0 = arith.constant 0 : i32
    return %arg0, %c0_i32 : i32, i32
  }
}

</mosaic_0001>

<bundles_post_ra>
// kernel: tpu_custom_call.1
= control target key start
LH: loop header
LB: loop body
LE: loop exit
PB: predicated region body
PF: predicated region fallthrough
CT: control target
= control target key end

     0   :  { %8 = vsyncpa [#allocation3], 0  ;;  %s380_s0 = inlined_call_operand.hbm [shape: bf16[8,128], index: 0, kind: input, shape index: {}]   ;;  %s381_s1 = inlined_call_operand.hbm [shape: bf16[8,128], index: 1, kind: input, shape index: {}]   ;;  %s382_s2 = inlined_call_operand.hbm [shape: bf16[16,128], index: 2, kind: input, shape index: {}]   ;;  %s383_s3 = inlined_call_operand.vmem [shape: f32[8,1], index: 3, kind: output, shape index: {}]  }
   0x1   :  { %9 = vsyncpa [#allocation5], 0  ;;  %s310_s12 = smov [#allocation4]   ;;  %s311_s14 = smov [#allocation2]  }
   0x2   :  { %s26_s13 = sshll.u32 %s310_s12, 4  ;;  %s16_s15 = sshll.u32 %s311_s14, 4  ;;  %s27_s13 = int_to_ptr.vmem [resolvable:$true] %s26_s13  ;;  %s17_s15 = int_to_ptr.vmem [resolvable:$true] %s16_s15 }
   0x3   :  { %s240_s18 = scalar_lea.hbm %s381_s1, 64 }
   0x4   :  { %p241_p0 = scmp.ne.s32.totalorder %s381_s1, %s240_s18  ;;  %p244_p1 = scmp.lt.u32.totalorder %s240_s18, %s381_s1 }
   0x6   :  { %p246_p2 = pnand %p244_p1, %p241_p0 }
   0x8   :  { %249 = shalt.err (!%p246_p2)
}
   0x9   :  { %s250_s23 = scalar_lea.vmem %s27_s13, 64  ;;  %p255_p4 = scmp.lt.s32.totalorder %s27_s13, %s27_s13 }
   0xa   :  { %p251_p3 = scmp.ne.s32.totalorder %s27_s13, %s250_s23  ;;  %p256_p5 = scmp.lt.s32.totalorder %s250_s23, %s250_s23 }
   0xc   :  { %p257_p6 = por %p256_p5, %p255_p4 }
   0xe   :  { %p258_p7 = pnand %p257_p6, %p251_p3 }
  0x10   :  { %261 = shalt.err (!%p258_p7)
}
  0x11   :  { %29 = dma.hbm_to_vmem [thread:$0]  %s381_s1, 64, %s27_s13, [#allocation5]  }
  0x12   :  { %s262_s28 = scalar_lea.hbm %s380_s0, 64 }
  0x13   :  { %p263_p8 = scmp.ne.s32.totalorder %s380_s0, %s262_s28  ;;  %p266_p9 = scmp.lt.u32.totalorder %s262_s28, %s380_s0 }
  0x15   :  { %p268_p10 = pnand %p266_p9, %p263_p8 }
  0x17   :  { %271 = shalt.err (!%p268_p10)
}
  0x18   :  { %s272_s6 = scalar_lea.vmem %s17_s15, 64  ;;  %p277_p12 = scmp.lt.s32.totalorder %s17_s15, %s17_s15 }
  0x19   :  { %p273_p11 = scmp.ne.s32.totalorder %s17_s15, %s272_s6  ;;  %p278_p13 = scmp.lt.s32.totalorder %s272_s6, %s272_s6 }
  0x1b   :  { %p279_p0 = por %p278_p13, %p277_p12 }
  0x1d   :  { %p280_p1 = pnand %p279_p0, %p273_p11 }
  0x1f   :  { %283 = shalt.err (!%p280_p1)
}
  0x20   :  { %19 = dma.hbm_to_vmem [thread:$0]  %s380_s0, 64, %s17_s15, [#allocation3]  }
  0x21   :  { %s312_s8 = smov [#allocation6]   ;;  %s284_s12 = scalar_lea.hbm %s382_s2, 128 }
  0x22   :  { %s35_s9 = sshll.u32 %s312_s8, 4  ;;  %p285_p2 = scmp.ne.s32.totalorder %s382_s2, %s284_s12  ;;  %s36_s9 = int_to_ptr.vmem [resolvable:$true] %s35_s9 }
  0x23   :  { %p288_p3 = scmp.lt.u32.totalorder %s284_s12, %s382_s2 }
  0x25   :  { %p290_p4 = pnand %p288_p3, %p285_p2 }
  0x27   :  { %293 = shalt.err (!%p290_p4)
}
  0x28   :  { %s294_s18 = scalar_lea.vmem %s36_s9, 128  ;;  %p299_p6 = scmp.lt.s32.totalorder %s36_s9, %s36_s9 }
  0x29   :  { %p295_p5 = scmp.ne.s32.totalorder %s36_s9, %s294_s18  ;;  %p300_p7 = scmp.lt.s32.totalorder %s294_s18, %s294_s18 }
  0x2b   :  { %p301_p8 = por %p300_p7, %p299_p6 }
  0x2d   :  { %p302_p9 = pnand %p301_p8, %p295_p5 }
  0x2f   :  { %305 = shalt.err (!%p302_p9)
}
  0x30   :  { %s313_s0 = smov 64   ;;  %s314_s15 = smov 4  }
  0x31   :  { %41 = dma.hbm_to_vmem [thread:$0]  %s382_s2, 128, %s36_s9, [#allocation5], %s313_s0, %s313_s0, %s314_s15  }
  0x32   :  { %306 = dma.done.wait [#allocation3], 64  }
  0x33   :  { %307 = vsyncadd [#allocation3], 4294967232 }
  0x34   :  { %308 = dma.done.wait [#allocation5], 192  }
  0x35   :  { %309 = vsyncadd [#allocation5], 4294967104  ;;  %v315_v0 = vmov 0.0   ;;  %vm316_vm0 = vmmov 0   ;;  %v231_v1 = vld [vmem:[#allocation6] sm:$0xff]   ;;  %v151_v4 = vlaneseq  ;;  %vm168_vm7 = vcmask 130048  }
  0x36   :  { %212 = vmatprep.subr.bf16.mxu0 %v315_v0  ;;  %218 = vmatprep.subr.bf16.mxu1 %v315_v0  ;;  %v53_v2 = vld [vmem:[#allocation2] sm:$0xf]  ;;  %v54_v3 = vld [vmem:[#allocation4] sm:$0xf]  ;;  %vm198_vm8 = vcmask 7168  }
  0x37   :  { %214 = vmatprep.mubr.msk.bf16.mxu0 %vm316_vm0, %v315_v0  ;;  %220 = vmatprep.mubr.msk.bf16.mxu1 %vm316_vm0, %v315_v0  ;;  %v156_v5 = vand.u32 127, %v151_v4  ;;  %v152_v7 = vshrl.u32 %v151_v4, 7  ;;  %v145_v24 = vunpack.c.l.bf16 %v53_v2  ;;  %v146_v25 = vunpack.c.l.bf16 %v54_v3 }
  0x38   :  { %213 = vmatpush3.bf16.xpose.msra.mxu0 %v231_v1  ;;  %219 = vmatpush3.bf16.xpose.msra.mxu1 %v231_v1 }
  0x39   :  { %v207_v6 = vadd.s32 4294967288, %v156_v5  ;;  %vm157_vm1 = vcmp.lt.s32.totalorder %v156_v5, 8  ;;  %v164_v9 = vadd.s32 8, %v152_v7  ;;  %vm161_vm3 = vcmp.eq.s32.totalorder %v156_v5, %v152_v7 }
  0x3a   :  { %v147_v26 = vmul.f32 %v146_v25, %v145_v24 }
  0x3b   :  { %v159_v8 = vsel %vm157_vm1, %v156_v5, %v207_v6  ;;  %vm165_vm4 = vcmp.eq.s32.totalorder %v156_v5, %v164_v9 }
  0x3c   :  { %vm160_vm2 = vcmp.ge.s32.totalorder %v159_v8, 8 }
  0x3d   :  { %vm162_vm5 = vmor %vm161_vm3, %vm160_vm2 }
  0x3e   :  { %vm166_vm6 = vmor %vm165_vm4, %vm160_vm2 }
  0x3f   :  { %215 = vmatmul.mubr.bf16.vlgmr.msra.gmra.mrb[0].mxu0 %v53_v2  ;;  %221 = vmatmul.mubr.bf16.vlgmr.msra.gmra.mrb[0].mxu1 %v54_v3 }
 0x112   :  { %v97_v10 = vpop.f32.mrb[0].mxu0  ;;  %v138_v11 = vpop.f32.mrb[0].mxu1 }
 0x113   :  { %v103_v12 = vmul.f32 2.0, %v97_v10  ;;  %v216_v13 = vpop.f32.mrb[1].mxu0  ;;  %v144_v14 = vmul.f32 2.0, %v138_v11  ;;  %v222_v15 = vpop.f32.mrb[1].mxu1 }
 0x114   :  { %v100_v16 = vpop.f32.mrb[2].mxu0  ;;  %v141_v17 = vpop.f32.mrb[2].mxu1 }
 0x115   :  { %v217_v18 = vpop.f32.mrb[3].mxu0  ;;  %v223_v19 = vpop.f32.mrb[3].mxu1  ;;  %v163_v20 = vsel %vm162_vm5, -inf, %v103_v12  ;;  %v167_v21 = vsel %vm166_vm6, -inf, %v144_v14 }
 0x116   :  { %v169_v22 = vsel %vm168_vm7, %v163_v20, -inf  ;;  %v172_v23 = vsel %vm168_vm7, %v167_v21, -inf }
 0x117   :  { %170 = vmax.xlane.f32.xlu0 %v169_v22 }
 0x11b   :  { %173 = vmax.xlane.f32.xlu0 %v172_v23 }
 0x11f   :  { %148 = vadd.xlane.f32.xlu0 %v147_v26 }
 0x1a4   :  { %v171_v27 = vpop.xlane.xlu0 %170 }
 0x1a5   :  { %v175_v28 = vsub.f32 %v163_v20, %v171_v27 }
 0x1a7   :  { %v176_v29 = vmul.f32 1.442695, %v175_v28 }
 0x1a8   :  { %v174_v30 = vpop.xlane.xlu0 %173 }
 0x1a9   :  { %232 = vpow2.f32 %v176_v29  ;;  %v184_v31 = vsub.f32 %v167_v21, %v174_v30 }
 0x1ab   :  { %v185_v32 = vmul.f32 1.442695, %v184_v31 }
 0x1ac   :  { %v149_v40 = vpop.xlane.xlu0 %148 }
 0x1ad   :  { %234 = vpow2.f32 %v185_v32  ;;  %v150_v42 = vmul.f32 2.0, %v149_v40 }
 0x1af   :  { %v194_v47 = vmul.f32 2.0, %v150_v42 }
 0x1b3   :  { %v233_v33 = vpop.eup %232 }
 0x1b4   :  { %v178_v34 = vsel %vm168_vm7, %v233_v33, 0.0 }
 0x1b5   :  { %179 = vadd.xlane.f32.xlu1 %v178_v34 }
 0x1b7   :  { %v235_v35 = vpop.eup %234 }
 0x1b8   :  { %v187_v36 = vsel %vm168_vm7, %v235_v35, 0.0 }
 0x1b9   :  { %188 = vadd.xlane.f32.xlu1 %v187_v36 }
 0x242   :  { %v180_v37 = vpop.xlane.xlu1 %179 }
 0x243   :  { %236 = vlog2.f32 %v180_v37 }
 0x246   :  { %v189_v38 = vpop.xlane.xlu1 %188 }
 0x247   :  { %238 = vlog2.f32 %v189_v38 }
 0x24d   :  { %v237_v39 = vpop.eup %236 }
 0x24e   :  { %v182_v41 = vmul.f32 0.6931472, %v237_v39 }
 0x250   :  { %v183_v45 = vadd.f32 %v182_v41, %v171_v27 }
 0x251   :  { %v239_v43 = vpop.eup %238 }
 0x252   :  { %v191_v44 = vmul.f32 0.6931472, %v239_v43 }
 0x254   :  { %v192_v46 = vadd.f32 %v191_v44, %v174_v30 }
 0x256   :  { %v193_v48 = vadd.f32 %v192_v46, %v183_v45 }
 0x258   :  { %v195_v49 = vsub.f32 %v193_v48, %v194_v47 }
 0x25a   :  { %199 = vst.msk [vmem:[%s383_s3] sm:$0xff] %vm198_vm8, %v195_v49 }
 0x25b   :  { %204 = vsyncpa [#allocation3], 1 }
 0x25c   :  { %205 = vsyncpa [#allocation5], 1 }

</bundles_post_ra>
